<compile_context>
chip_gen: v7x
topology: tpu7x:2x2x1
jax: 0.10.0
libtpu: 0.0.40
codegen_flags: <defaults>
</compile_context>

<pallas_src>
import functools

import jax
import jax.numpy as jnp
from jax.experimental import pallas as pl
from jax.experimental.pallas import tpu as pltpu

_LANE = 128
_SUB = 16  # sublane granularity for the batch tile (covers bf16 (16,128) packing)


def _round_up(x: int, m: int) -> int:
    return (x + m - 1) // m * m


def _itemsize(dtype) -> int:
    return jnp.dtype(dtype).itemsize


def _mlp_pi_kernel(x_ref, w1_ref, b1_ref, w2_ref, b2_ref, w3_ref, b3_ref, o_ref):
    """Fused 3-layer MLP + tanh for one batch tile; all weights resident in VMEM.

    x arrives in its HBM dtype (f32) and is cast to the MXU feed dtype in-kernel;
    dots accumulate in f32, bias/relu/tanh stay f32, inter-layer staging is in the
    MXU feed dtype, and the final (lane-dense) store is in o_ref's dtype.
    """
    x = x_ref[...].astype(w1_ref.dtype)

    h1 = jnp.dot(x, w1_ref[...], preferred_element_type=jnp.float32) + b1_ref[...]
    h1 = jnp.maximum(h1, 0.0).astype(w2_ref.dtype)  # relu (f32) -> stage in feed dtype

    h2 = jnp.dot(h1, w2_ref[...], preferred_element_type=jnp.float32) + b2_ref[...]
    h2 = jnp.maximum(h2, 0.0).astype(w3_ref.dtype)

    a = jnp.dot(h2, w3_ref[...], preferred_element_type=jnp.float32) + b3_ref[...]
    o_ref[...] = jnp.tanh(a).astype(o_ref.dtype)  # lane-dense (128-multiple) store


def init_mlp_pi_params(key, input_dim, hidden_size, output_dim):
    """nn.Linear-style U(-1/sqrt(fan_in), +1/sqrt(fan_in)) init (f32, unpadded).

    Weights stored as (in_features, out_features) so the kernel computes x @ W + b,
    equivalent to PyTorch's x @ W.T with its (out, in) storage.
    """
    dims = [input_dim] + list(hidden_size) + [output_dim]
    params = []
    for li in range(len(dims) - 1):
        fan_in, fan_out = dims[li], dims[li + 1]
        key, kw, kb = jax.random.split(key, 3)
        bound = 1.0 / jnp.sqrt(jnp.float32(fan_in))
        w = jax.random.uniform(kw, (fan_in, fan_out), jnp.float32, -bound, bound)
        b = jax.random.uniform(kb, (1, fan_out), jnp.float32, -bound, bound)
        params += [w, b]
    return tuple(params)


def pad_mlp_pi_params(params, mxu_dtype=jnp.bfloat16):
    """Zero-pad layer *output* widths to multiples of 128 (lane-dense stores / MXU N),
    match each layer's input rows to the previous layer's padded width, and cast the
    weights to the MXU feed dtype.  The first layer's input rows stay unpadded (the
    state is fed with its raw feature dim).  Biases stay f32 (added post-accumulation).
    Call once at init time, not per forward."""
    padded = []
    prev_cols = None
    for li, (w, b) in enumerate(zip(params[0::2], params[1::2])):
        rows = w.shape[0] if li == 0 else prev_cols
        cols = _round_up(w.shape[1], _LANE)
        wp = jnp.pad(w, ((0, rows - w.shape[0]), (0, cols - w.shape[1])))
        bp = jnp.pad(b, ((0, 0), (0, cols - b.shape[1])))
        padded += [wp.astype(mxu_dtype), bp.astype(jnp.float32)]
        prev_cols = cols
    return tuple(padded)


def _const_spec(arr):
    """BlockSpec for a grid-invariant (weight/bias) operand: whole array, constant
    block index, single-buffered when the pipeline_mode kwarg is available."""
    shape = arr.shape
    idx = lambda i: (0,) * len(shape)
    try:
        return pl.BlockSpec(shape, idx, pipeline_mode=pl.Buffered(1))
    except (TypeError, AttributeError):
        return pl.BlockSpec(shape, idx)


def _choose_batch_tile(B: int, tile_b: int):
    """Pick the per-step row count.  Small batches run in one step; larger batches
    keep >= 2 grid steps (so v7x's two TensorCores both get work) with at most
    `tile_b` rows per step."""
    tile_b = max(_SUB, (int(tile_b) // _SUB) * _SUB)
    bp_min = _round_up(B, _SUB)
    small_cap = min(tile_b, 256)
    if bp_min <= small_cap:
        tb = bp_min
    else:
        half = _round_up((bp_min + 1) // 2, _SUB)
        tb = max(_SUB, min(tile_b, half))
    bp = _round_up(B, tb)
    return tb, bp


@functools.partial(jax.jit, static_argnames=("out_dim", "tile_b", "out_dtype"))
def mlp_pi_forward(s, padded_params, *, out_dim, tile_b=1024, out_dtype=None):
    """Pallas wrapper.  s: (B, input_dim); padded_params from pad_mlp_pi_params.
    Returns (B, out_dim) in `out_dtype` (defaults to the weights' dtype)."""
    w1, b1, w2, b2, w3, b3 = padded_params
    B, in_dim = s.shape
    assert w1.shape[0] == in_dim, "state feature dim must match W1 rows (unpadded)"
    h1_p, h2_p, out_p = w1.shape[1], w2.shape[1], w3.shape[1]
    if out_dtype is None:
        out_dtype = w1.dtype

    tb, Bp = _choose_batch_tile(B, tile_b)
    grid = (Bp // tb,)

    # Pad only the batch dim (no feature-dim pad, no wrapper-side dtype cast).
    x = s if Bp == B else jnp.pad(s, ((0, Bp - B), (0, 0)))

    param_bytes = sum(int(a.size) * _itemsize(a.dtype) for a in padded_params)

    # VMEM budget: double-buffered x/out tiles, single-buffered weights, generous
    # allowance for the f32 accumulators + staged intermediates.
    footprint = (2 * tb * in_dim * _itemsize(x.dtype)
                 + 2 * tb * out_p * _itemsize(out_dtype)
                 + param_bytes
                 + 3 * tb * (h1_p + h2_p) * 4)
    vmem_limit = int(min(max(32 << 20, 2 * footprint), 128 << 20))

    cost = pl.CostEstimate(
        flops=2 * Bp * (in_dim * h1_p + h1_p * h2_p + h2_p * out_p),
        transcendentals=Bp * out_p,
        bytes_accessed=(Bp * in_dim * _itemsize(x.dtype)
                        + Bp * out_p * _itemsize(out_dtype)
                        + param_bytes),
    )

    out = pl.pallas_call(
        _mlp_pi_kernel,
        out_shape=jax.ShapeDtypeStruct((Bp, out_p), out_dtype),
        grid_spec=pltpu.PrefetchScalarGridSpec(
            num_scalar_prefetch=0,
            grid=grid,
            in_specs=[
                pl.BlockSpec((tb, in_dim), lambda i: (i, 0)),  # state tile (feature dim unpadded)
                _const_spec(w1), _const_spec(b1),              # resident, single-buffered
                _const_spec(w2), _const_spec(b2),
                _const_spec(w3), _const_spec(b3),
            ],
            out_specs=pl.BlockSpec((tb, out_p), lambda i: (i, 0)),
        ),
        compiler_params=pltpu.CompilerParams(
            dimension_semantics=("parallel",),  # batch axis shards across TCs (v7x)
            vmem_limit_bytes=vmem_limit,        # v5e scoped default is only 16 MiB
        ),
        cost_estimate=cost,
    )(x, w1, b1, w2, b2, w3, b3)

    # Strip batch padding and the zero output lanes added for store density.
    return out[:B, :out_dim]


def mlp_pi_reference(s, params):
    """Pure-JAX f32 reference for correctness checking."""
    w1, b1, w2, b2, w3, b3 = params
    h1 = jnp.maximum(s @ w1 + b1, 0.0)
    h2 = jnp.maximum(h1 @ w2 + b2, 0.0)
    return jnp.tanh(h2 @ w3 + b3)


# TODO(synk): layer_norm=True / dropout_rate>0 branches of the original MLP are not
# implemented (module defaults disable them); add fused LN / PRNG dropout if needed.

if __name__ == "__main__":
    key = jax.random.PRNGKey(0)

    # Small shapes consistent with MLPPi (module default hidden=[256, 256]);
    # deliberately awkward batch / feature dims to exercise the padding paths.
    batch, input_dim, output_dim = 37, 17, 6
    hidden_size = [256, 256]

    key, k_s = jax.random.split(key)
    s = jax.random.normal(k_s, (batch, input_dim), jnp.float32)
    params = init_mlp_pi_params(key, input_dim, hidden_size, output_dim)
    a_ref = mlp_pi_reference(s, params)

    # (1) f32 MXU feed / f32 output: tight check against the pure-JAX reference.
    p_f32 = pad_mlp_pi_params(params, mxu_dtype=jnp.float32)
    a_f32 = jax.block_until_ready(mlp_pi_forward(s, p_f32, out_dim=output_dim))
    assert a_f32.shape == (batch, output_dim)
    assert a_f32.dtype == jnp.float32
    assert jnp.allclose(a_f32, a_ref, atol=1e-5, rtol=1e-5), "f32 kernel mismatch"

    # (2) bf16 MXU feed / bf16 output (recommended), f32 accumulation inside.
    p_bf16 = pad_mlp_pi_params(params, mxu_dtype=jnp.bfloat16)
    a_bf16 = jax.block_until_ready(mlp_pi_forward(s, p_bf16, out_dim=output_dim))
    assert a_bf16.shape == (batch, output_dim)
    assert jnp.allclose(a_bf16.astype(jnp.float32), a_ref, atol=5e-2, rtol=5e-2), \
        "bf16 kernel mismatch"

    # (3) larger batch -> multi-step grid (tile capped at ceil(Bp/2) so the grid has
    #     >= 2 steps and both v7x TensorCores are busy).
    key, k_s2 = jax.random.split(key)
    s2 = jax.random.normal(k_s2, (512, input_dim), jnp.float32)
    a2 = jax.block_until_ready(
        mlp_pi_forward(s2, p_bf16, out_dim=output_dim, tile_b=1024))
    a2_ref = mlp_pi_reference(s2, params)
    assert a2.shape == (512, output_dim)
    assert jnp.allclose(a2.astype(jnp.float32), a2_ref, atol=5e-2, rtol=5e-2), \
        "large-batch mismatch"

    print("KERNEL_OK")
</pallas_src>

<mosaic_0001>
module attributes {stable_mosaic.version = 11 : i64} {
  func.func @_mlp_pi_kernel(%arg0: i32, %arg1: memref<48x17xf32, #tpu.memory_space<vmem>>, %arg2: memref<17x256xf32, #tpu.memory_space<vmem>>, %arg3: memref<1x256xf32, #tpu.memory_space<vmem>>, %arg4: memref<256x256xf32, #tpu.memory_space<vmem>>, %arg5: memref<1x256xf32, #tpu.memory_space<vmem>>, %arg6: memref<256x128xf32, #tpu.memory_space<vmem>>, %arg7: memref<1x128xf32, #tpu.memory_space<vmem>>, %arg8: memref<48x128xf32, #tpu.memory_space<vmem>>) attributes {dimension_semantics = [#tpu.dimension_semantics<parallel>], iteration_bounds = array<i64: 1>, scalar_prefetch = 0 : i64, scratch_operands = 0 : i64, tpu.core_type = #tpu.core_type<tc>, window_params = [{transform_indices = @transform_0, window_bounds = array<i64: 48, 17>}, {pipeline_mode = #tpu.pipeline_mode<synchronous>, transform_indices = @transform_1, window_bounds = array<i64: 17, 256>}, {pipeline_mode = #tpu.pipeline_mode<synchronous>, transform_indices = @transform_2, window_bounds = array<i64: 1, 256>}, {pipeline_mode = #tpu.pipeline_mode<synchronous>, transform_indices = @transform_3, window_bounds = array<i64: 256, 256>}, {pipeline_mode = #tpu.pipeline_mode<synchronous>, transform_indices = @transform_4, window_bounds = array<i64: 1, 256>}, {pipeline_mode = #tpu.pipeline_mode<synchronous>, transform_indices = @transform_5, window_bounds = array<i64: 256, 128>}, {pipeline_mode = #tpu.pipeline_mode<synchronous>, transform_indices = @transform_6, window_bounds = array<i64: 1, 128>}, {transform_indices = @transform_7, window_bounds = array<i64: 48, 128>}]} {
    %c0 = arith.constant 0 : index
    %c0_0 = arith.constant 0 : index
    %0 = vector.load %arg1[%c0, %c0_0] : memref<48x17xf32, #tpu.memory_space<vmem>>, vector<48x17xf32>
    %c0_1 = arith.constant 0 : index
    %c0_2 = arith.constant 0 : index
    %1 = vector.load %arg2[%c0_1, %c0_2] : memref<17x256xf32, #tpu.memory_space<vmem>>, vector<17x256xf32>
    %cst = arith.constant dense<0.000000e+00> : vector<48x256xf32>
    %2 = tpu.matmul %0, %1, %cst {dimension_numbers = #tpu.dot_dimension_numbers<[1], [0], [0], [1], [0, 0, 1, 1], [], []>} : vector<48x17xf32>, vector<17x256xf32>, vector<48x256xf32> -> vector<48x256xf32>
    %c0_3 = arith.constant 0 : index
    %c0_4 = arith.constant 0 : index
    %3 = vector.load %arg3[%c0_3, %c0_4] : memref<1x256xf32, #tpu.memory_space<vmem>>, vector<1x256xf32>
    %4 = vector.broadcast %3 : vector<1x256xf32> to vector<48x256xf32>
    %5 = arith.addf %2, %4 : vector<48x256xf32>
    %cst_5 = arith.constant 0.000000e+00 : f32
    %6 = vector.broadcast %cst_5 : f32 to vector<48x256xf32>
    %7 = arith.maximumf %5, %6 : vector<48x256xf32>
    %c0_6 = arith.constant 0 : index
    %c0_7 = arith.constant 0 : index
    %8 = vector.load %arg4[%c0_6, %c0_7] : memref<256x256xf32, #tpu.memory_space<vmem>>, vector<256x256xf32>
    %cst_8 = arith.constant dense<0.000000e+00> : vector<48x256xf32>
    %9 = tpu.matmul %7, %8, %cst_8 {dimension_numbers = #tpu.dot_dimension_numbers<[1], [0], [0], [1], [0, 0, 1, 1], [], []>} : vector<48x256xf32>, vector<256x256xf32>, vector<48x256xf32> -> vector<48x256xf32>
    %c0_9 = arith.constant 0 : index
    %c0_10 = arith.constant 0 : index
    %10 = vector.load %arg5[%c0_9, %c0_10] : memref<1x256xf32, #tpu.memory_space<vmem>>, vector<1x256xf32>
    %11 = vector.broadcast %10 : vector<1x256xf32> to vector<48x256xf32>
    %12 = arith.addf %9, %11 : vector<48x256xf32>
    %cst_11 = arith.constant 0.000000e+00 : f32
    %13 = vector.broadcast %cst_11 : f32 to vector<48x256xf32>
    %14 = arith.maximumf %12, %13 : vector<48x256xf32>
    %c0_12 = arith.constant 0 : index
    %c0_13 = arith.constant 0 : index
    %15 = vector.load %arg6[%c0_12, %c0_13] : memref<256x128xf32, #tpu.memory_space<vmem>>, vector<256x128xf32>
    %cst_14 = arith.constant dense<0.000000e+00> : vector<48x128xf32>
    %16 = tpu.matmul %14, %15, %cst_14 {dimension_numbers = #tpu.dot_dimension_numbers<[1], [0], [0], [1], [0, 0, 1, 1], [], []>} : vector<48x256xf32>, vector<256x128xf32>, vector<48x128xf32> -> vector<48x128xf32>
    %c0_15 = arith.constant 0 : index
    %c0_16 = arith.constant 0 : index
    %17 = vector.load %arg7[%c0_15, %c0_16] : memref<1x128xf32, #tpu.memory_space<vmem>>, vector<1x128xf32>
    %18 = vector.broadcast %17 : vector<1x128xf32> to vector<48x128xf32>
    %19 = arith.addf %16, %18 : vector<48x128xf32>
    %20 = math.tanh %19 : vector<48x128xf32>
    %c0_17 = arith.constant 0 : index
    %c0_18 = arith.constant 0 : index
    %21 = vector.load %arg8[%c0_17, %c0_18] : memref<48x128xf32, #tpu.memory_space<vmem>>, vector<48x128xf32>
    tpu.vector_store %arg8[%c0_17, %c0_18], %20 {strides = array<i32>} : memref<48x128xf32, #tpu.memory_space<vmem>>, vector<48x128xf32>,
    return
  }
  func.func @transform_0(%arg0: i32) -> (i32, i32) {
    %c0_i32 = arith.constant 0 : i32
    %c0_i32_0 = arith.constant 0 : i32
    return %arg0, %c0_i32 : i32, i32
  }
  func.func @transform_1(%arg0: i32) -> (i32, i32) {
    %c0_i32 = arith.constant 0 : i32
    %c0_i32_0 = arith.constant 0 : i32
    %c0_i32_1 = arith.constant 0 : i32
    return %c0_i32, %c0_i32_0 : i32, i32
  }
  func.func @transform_2(%arg0: i32) -> (i32, i32) {
    %c0_i32 = arith.constant 0 : i32
    %c0_i32_0 = arith.constant 0 : i32
    %c0_i32_1 = arith.constant 0 : i32
    return %c0_i32, %c0_i32_0 : i32, i32
  }
  func.func @transform_3(%arg0: i32) -> (i32, i32) {
    %c0_i32 = arith.constant 0 : i32
    %c0_i32_0 = arith.constant 0 : i32
    %c0_i32_1 = arith.constant 0 : i32
    return %c0_i32, %c0_i32_0 : i32, i32
  }
  func.func @transform_4(%arg0: i32) -> (i32, i32) {
    %c0_i32 = arith.constant 0 : i32
    %c0_i32_0 = arith.constant 0 : i32
    %c0_i32_1 = arith.constant 0 : i32
    return %c0_i32, %c0_i32_0 : i32, i32
  }
  func.func @transform_5(%arg0: i32) -> (i32, i32) {
    %c0_i32 = arith.constant 0 : i32
    %c0_i32_0 = arith.constant 0 : i32
    %c0_i32_1 = arith.constant 0 : i32
    return %c0_i32, %c0_i32_0 : i32, i32
  }
  func.func @transform_6(%arg0: i32) -> (i32, i32) {
    %c0_i32 = arith.constant 0 : i32
    %c0_i32_0 = arith.constant 0 : i32
    %c0_i32_1 = arith.constant 0 : i32
    return %c0_i32, %c0_i32_0 : i32, i32
  }
  func.func @transform_7(%arg0: i32) -> (i32, i32) {
    %c0_i32 = arith.constant 0 : i32
    %c0_i32_0 = arith.constant 0 : i32
    return %arg0, %c0_i32 : i32, i32
  }
}

</mosaic_0001>

<bundles_post_ra>
// kernel: mlp_pi_forward.1
= control target key start
LH: loop header
LB: loop body
LE: loop exit
PB: predicated region body
PF: predicated region fallthrough
CT: control target
= control target key end

     0   :  { %12 = vsyncpa [#allocation3], 0  ;;  %s944_s0 = inlined_call_operand.vmem [shape: f32[48,17], index: 0, kind: input, shape index: {}]   ;;  %s945_s1 = inlined_call_operand.vmem [shape: f32[17,256], index: 1, kind: input, shape index: {}]   ;;  %s946_s2 = inlined_call_operand.vmem [shape: f32[1,256], index: 2, kind: input, shape index: {}]   ;;  %s947_s3 = inlined_call_operand.hbm [shape: f32[256,256], index: 3, kind: input, shape index: {}]   ;;  %s948_s4 = inlined_call_operand.vmem [shape: f32[1,256], index: 4, kind: input, shape index: {}]   ;;  %s949_s5 = inlined_call_operand.hbm [shape: f32[256,128], index: 5, kind: input, shape index: {}]   ;;  %s950_s6 = inlined_call_operand.vmem [shape: f32[1,128], index: 6, kind: input, shape index: {}]   ;;  %s951_s7 = inlined_call_operand.vmem [shape: f32[48,128], index: 7, kind: output, shape index: {}]  }
   0x1   :  { %13 = vsyncpa [#allocation5], 0  ;;  %s784_s24 = smov [#allocation2]   ;;  %s736_s28 = scalar_lea.hbm %s947_s3, 8192 }
   0x2   :  { %s25_s25 = sshll.u32 %s784_s24, 4  ;;  %p737_p0 = scmp.ne.s32.totalorder %s947_s3, %s736_s28  ;;  %s26_s25 = int_to_ptr.vmem [resolvable:$true] %s25_s25 }
   0x3   :  { %p740_p1 = scmp.lt.u32.totalorder %s736_s28, %s947_s3 }
   0x5   :  { %p742_p2 = pnand %p740_p1, %p737_p0 }
   0x7   :  { %745 = shalt.err (!%p742_p2)
}
   0x8   :  { %s746_s10 = scalar_lea.vmem %s26_s25, 8192  ;;  %p751_p4 = scmp.lt.s32.totalorder %s26_s25, %s26_s25 }
   0x9   :  { %p747_p3 = scmp.ne.s32.totalorder %s26_s25, %s746_s10  ;;  %p752_p5 = scmp.lt.s32.totalorder %s746_s10, %s746_s10 }
   0xb   :  { %p753_p6 = por %p752_p5, %p751_p4 }
   0xd   :  { %p754_p7 = pnand %p753_p6, %p747_p3 }
   0xf   :  { %757 = shalt.err (!%p754_p7)
}
  0x10   :  { %s785_s11 = smov 256   ;;  %s786_s12 = smov 16  }
  0x11   :  { %31 = dma.hbm_to_vmem [thread:$0]  %s947_s3, 8192, %s26_s25, [#allocation3], %s785_s11, %s785_s11, %s786_s12  }
  0x12   :  { %s787_s15 = smov [#allocation4]   ;;  %s758_s19 = scalar_lea.hbm %s949_s5, 4096 }
  0x13   :  { %s39_s16 = sshll.u32 %s787_s15, 4  ;;  %p759_p8 = scmp.ne.s32.totalorder %s949_s5, %s758_s19  ;;  %s40_s16 = int_to_ptr.vmem [resolvable:$true] %s39_s16 }
  0x14   :  { %p762_p9 = scmp.lt.u32.totalorder %s758_s19, %s949_s5 }
  0x16   :  { %p764_p10 = pnand %p762_p9, %p759_p8 }
  0x18   :  { %767 = shalt.err (!%p764_p10)
}
  0x19   :  { %s768_s24 = scalar_lea.vmem %s40_s16, 4096  ;;  %p773_p12 = scmp.lt.s32.totalorder %s40_s16, %s40_s16 }
  0x1a   :  { %p769_p11 = scmp.ne.s32.totalorder %s40_s16, %s768_s24  ;;  %p774_p13 = scmp.lt.s32.totalorder %s768_s24, %s768_s24 }
  0x1c   :  { %p775_p0 = por %p774_p13, %p773_p12 }
  0x1e   :  { %p776_p1 = pnand %p775_p0, %p769_p11 }
  0x20   :  { %779 = shalt.err (!%p776_p1)
}
  0x21   :  { %s788_s3 = smov 128   ;;  %s789_s25 = smov 8  }
  0x22   :  { %45 = dma.hbm_to_vmem [thread:$0]  %s949_s5, 4096, %s40_s16, [#allocation5], %s788_s3, %s788_s3, %s789_s25  }
  0x23   :  { %780 = dma.done.wait [#allocation3], 8192  }
  0x24   :  { %781 = vsyncadd [#allocation3], 4294959104 }
  0x25   :  { %782 = dma.done.wait [#allocation5], 4096  }
  0x26   :  { %783 = vsyncadd [#allocation5], 4294963200  ;;  %v790_v0 = vmov 0.0   ;;  %v61_v1 = vld [vmem:[%s945_s1 + $0x8] sm:$0xff]  ;;  %v63_v2 = vld [vmem:[%s945_s1 + $0x18] sm:$0xff]  ;;  %vm97_vm0 = vcmask 1040384  }
  0x27   :  { %168 = vmatprep.mubr.f32.mxu0 %v790_v0  ;;  %v60_v3 = vld [vmem:[%s945_s1] sm:$0xff]  ;;  %v617_v4 = vpack.c.bf16 %v63_v2, %v61_v1  ;;  %v62_v5 = vld [vmem:[%s945_s1 + $0x10] sm:$0xff]  ;;  %v65_v7 = vld [vmem:[%s945_s1 + $0x28] sm:$0x1]  ;;  %vm78_vm1 = vcmask 138240  }
  0x28   :  { %v619_v6 = vpack.c.bf16 %v62_v5, %v60_v3  ;;  %v64_v8 = vld [vmem:[%s945_s1 + $0x20] sm:$0x1]  ;;  %v218_v10 = vld [vmem:[#allocation2 + $0x8] sm:$0xff]  ;;  %v220_v11 = vld [vmem:[#allocation2 + $0x18] sm:$0xff] }
  0x29   :  { %618 = vmatprep.subr.bf16.mxu0 %v617_v4  ;;  %v54_v9 = vld [vmem:[%s944_s0] sm:$0xff]  ;;  %v621_v13 = vpack.c.bf16 %v220_v11, %v218_v10  ;;  %v219_v14 = vld [vmem:[#allocation2 + $0x10] sm:$0xff]  ;;  %v222_v15 = vld [vmem:[#allocation2 + $0x28] sm:$0xff] }
  0x2a   :  { %620 = vmatpush1.bf16.msra.mxu0 %v619_v6  ;;  %v217_v12 = vld [vmem:[#allocation2] sm:$0xff]  ;;  %v224_v16 = vld [vmem:[#allocation2 + $0x38] sm:$0xff]  ;;  %v223_v20 = vld [vmem:[#allocation2 + $0x30] sm:$0xff] }
  0x2b   :  { %558 = vmatprep.subr.msk.mxu0 %vm97_vm0, %v65_v7  ;;  %v623_v17 = vpack.c.bf16 %v219_v14, %v217_v12  ;;  %v625_v18 = vpack.c.bf16 %v224_v16, %v222_v15  ;;  %v221_v19 = vld [vmem:[#allocation2 + $0x20] sm:$0xff]  ;;  %v226_v21 = vld [vmem:[#allocation2 + $0x48] sm:$0xff]  ;;  %622 = vmatprep.subr.bf16.mxu1 %v621_v13  ;;  %v228_v22 = vld [vmem:[#allocation2 + $0x58] sm:$0xff] }
  0x2c   :  { %v627_v23 = vpack.c.bf16 %v223_v20, %v221_v19  ;;  %v629_v24 = vpack.c.bf16 %v228_v22, %v226_v21  ;;  %v225_v25 = vld [vmem:[#allocation2 + $0x40] sm:$0xff]  ;;  %v227_v26 = vld [vmem:[#allocation2 + $0x50] sm:$0xff]  ;;  %v55_v27 = vld [vmem:[%s944_s0 + $0x8] sm:$0xff] }
  0x2d   :  { %624 = vmatpush1.bf16.msra.mxu1 %v623_v17  ;;  %v230_v28 = vld [vmem:[#allocation2 + $0x68] sm:$0xff]  ;;  %v232_v29 = vld [vmem:[#allocation2 + $0x78] sm:$0xff]  ;;  %v631_v30 = vpack.c.bf16 %v227_v26, %v225_v25  ;;  %v229_v32 = vld [vmem:[#allocation2 + $0x60] sm:$0xff] }
  0x2e   :  { %559 = vmatpush1.msk.msra.mxu0 %vm97_vm0, %v64_v8  ;;  %626 = vmatprep.subr.bf16.mxu1 %v625_v18  ;;  %v633_v31 = vpack.c.bf16 %v232_v29, %v230_v28  ;;  %v231_v33 = vld [vmem:[#allocation2 + $0x70] sm:$0xff]  ;;  %v234_v35 = vld [vmem:[#allocation2 + $0x88] sm:$0xff]  ;;  %v236_v36 = vld [vmem:[#allocation2 + $0x98] sm:$0xff] }
  0x2f   :  { %560 = vmatmul.mubr.msk.f32.vlgmr.msra.gmra.mrb[0].mxu0 %vm78_vm1, %v54_v9  ;;  %v56_v34 = vld [vmem:[%s944_s0 + $0x10] sm:$0xff]  ;;  %v635_v37 = vpack.c.bf16 %v231_v33, %v229_v32  ;;  %v637_v38 = vpack.c.bf16 %v236_v36, %v234_v35  ;;  %v233_v39 = vld [vmem:[#allocation2 + $0x80] sm:$0xff]  ;;  %v57_v41 = vld [vmem:[%s944_s0 + $0x18] sm:$0xff] }
  0x30   :  { %174 = vmatprep.mubr.f32.mxu0 %v790_v0  ;;  %v235_v40 = vld [vmem:[#allocation2 + $0x90] sm:$0xff]  ;;  %v238_v42 = vld [vmem:[#allocation2 + $0xa8] sm:$0xff]  ;;  %v240_v43 = vld [vmem:[#allocation2 + $0xb8] sm:$0xff] }
  0x31   :  { %628 = vmatpush1.bf16.msra.mxu1 %v627_v23  ;;  %v639_v44 = vpack.c.bf16 %v235_v40, %v233_v39  ;;  %v641_v45 = vpack.c.bf16 %v240_v43, %v238_v42  ;;  %v237_v46 = vld [vmem:[#allocation2 + $0xa0] sm:$0xff]  ;;  %v239_v47 = vld [vmem:[#allocation2 + $0xb0] sm:$0xff]  ;;  %v242_v49 = vld [vmem:[#allocation2 + $0xc8] sm:$0xff] }
  0x32   :  { %630 = vmatprep.subr.bf16.mxu1 %v629_v24  ;;  %v58_v48 = vld [vmem:[%s944_s0 + $0x20] sm:$0xff]  ;;  %v244_v50 = vld [vmem:[#allocation2 + $0xd8] sm:$0xff]  ;;  %v643_v51 = vpack.c.bf16 %v239_v47, %v237_v46  ;;  %v243_v54 = vld [vmem:[#allocation2 + $0xd0] sm:$0xff] }
  0x33   :  { %561 = vmatmul.mubr.msk.f32.gmra.mrb[2].mxu0 %vm78_vm1, %v55_v27  ;;  %v645_v52 = vpack.c.bf16 %v244_v50, %v242_v49  ;;  %v241_v53 = vld [vmem:[#allocation2 + $0xc0] sm:$0xff]  ;;  %v59_v55 = vld [vmem:[%s944_s0 + $0x28] sm:$0xff]  ;;  %v248_v57 = vld [vmem:[#allocation2 + $0xf8] sm:$0xff] }
  0x34   :  { %180 = vmatprep.mubr.f32.mxu0 %v790_v0  ;;  %v246_v56 = vld [vmem:[#allocation2 + $0xe8] sm:$0xff]  ;;  %v647_v58 = vpack.c.bf16 %v243_v54, %v241_v53  ;;  %v245_v60 = vld [vmem:[#allocation2 + $0xe0] sm:$0xff]  ;;  %v247_v61 = vld [vmem:[#allocation2 + $0xf0] sm:$0xff] }
  0x35   :  { %632 = vmatpush1.bf16.msra.mxu1 %v631_v30  ;;  %v649_v59 = vpack.c.bf16 %v248_v57, %v246_v56  ;;  %v250_v62 = vld [vmem:[#allocation2 + $0x108] sm:$0xff]  ;;  %v252_v63 = vld [vmem:[#allocation2 + $0x118] sm:$0xff]  ;;  %v651_v1 = vpack.c.bf16 %v247_v61, %v245_v60  ;;  %v249_v2 = vld [vmem:[#allocation2 + $0x100] sm:$0xff] }
  0x36   :  { %634 = vmatprep.subr.bf16.mxu1 %v633_v31  ;;  %v251_v3 = vld [vmem:[#allocation2 + $0x110] sm:$0xff]  ;;  %v254_v4 = vld [vmem:[#allocation2 + $0x128] sm:$0xff]  ;;  %v256_v5 = vld [vmem:[#allocation2 + $0x138] sm:$0xff] }
  0x37   :  { %562 = vmatmul.mubr.msk.f32.gmra.mrb[4].mxu0 %vm78_vm1, %v56_v34  ;;  %v655_v6 = vpack.c.bf16 %v251_v3, %v249_v2  ;;  %v657_v7 = vpack.c.bf16 %v256_v5, %v254_v4  ;;  %v253_v8 = vld [vmem:[#allocation2 + $0x120] sm:$0xff]  ;;  %v255_v9 = vld [vmem:[#allocation2 + $0x130] sm:$0xff]  ;;  %v258_v10 = vld [vmem:[#allocation2 + $0x148] sm:$0xff] }
  0x38   :  { %186 = vmatprep.mubr.f32.mxu0 %v790_v0  ;;  %v260_v11 = vld [vmem:[#allocation2 + $0x158] sm:$0xff]  ;;  %v659_v12 = vpack.c.bf16 %v255_v9, %v253_v8  ;;  %v257_v14 = vld [vmem:[#allocation2 + $0x140] sm:$0xff]  ;;  %v259_v15 = vld [vmem:[#allocation2 + $0x150] sm:$0xff] }
  0x39   :  { %636 = vmatpush1.bf16.msra.mxu1 %v635_v37  ;;  %v661_v13 = vpack.c.bf16 %v260_v11, %v258_v10  ;;  %v262_v16 = vld [vmem:[#allocation2 + $0x168] sm:$0xff]  ;;  %v264_v17 = vld [vmem:[#allocation2 + $0x178] sm:$0xff]  ;;  %v663_v18 = vpack.c.bf16 %v259_v15, %v257_v14  ;;  %v261_v20 = vld [vmem:[#allocation2 + $0x160] sm:$0xff] }
  0x3a   :  { %638 = vmatprep.subr.bf16.mxu1 %v637_v38  ;;  %v665_v19 = vpack.c.bf16 %v264_v17, %v262_v16  ;;  %v263_v21 = vld [vmem:[#allocation2 + $0x170] sm:$0xff]  ;;  %v266_v22 = vld [vmem:[#allocation2 + $0x188] sm:$0xff]  ;;  %v268_v23 = vld [vmem:[#allocation2 + $0x198] sm:$0xff] }
  0x3b   :  { %563 = vmatmul.mubr.msk.f32.gmra.mrb[6].mxu0 %vm78_vm1, %v57_v41  ;;  %v667_v24 = vpack.c.bf16 %v263_v21, %v261_v20  ;;  %v669_v25 = vpack.c.bf16 %v268_v23, %v266_v22  ;;  %v265_v26 = vld [vmem:[#allocation2 + $0x180] sm:$0xff]  ;;  %v267_v27 = vld [vmem:[#allocation2 + $0x190] sm:$0xff]  ;;  %v270_v28 = vld [vmem:[#allocation2 + $0x1a8] sm:$0xff]  ;;  %v68_v22 = vlaneseq }
  0x3c   :  { %192 = vmatprep.mubr.f32.mxu0 %v790_v0  ;;  %v272_v29 = vld [vmem:[#allocation2 + $0x1b8] sm:$0xff]  ;;  %v671_v30 = vpack.c.bf16 %v267_v27, %v265_v26  ;;  %v269_v32 = vld [vmem:[#allocation2 + $0x1a0] sm:$0xff]  ;;  %v271_v33 = vld [vmem:[#allocation2 + $0x1b0] sm:$0xff] }
  0x3d   :  { %640 = vmatpush1.bf16.msra.mxu1 %v639_v44  ;;  %v673_v31 = vpack.c.bf16 %v272_v29, %v270_v28  ;;  %v274_v34 = vld [vmem:[#allocation2 + $0x1c8] sm:$0xff]  ;;  %v276_v35 = vld [vmem:[#allocation2 + $0x1d8] sm:$0xff]  ;;  %v675_v36 = vpack.c.bf16 %v271_v33, %v269_v32  ;;  %v273_v38 = vld [vmem:[#allocation2 + $0x1c0] sm:$0xff]  ;;  %v905_v23 = vshrl.u32 %v68_v22, 7 }
  0x3e   :  { %642 = vmatprep.subr.bf16.mxu1 %v641_v45  ;;  %v677_v37 = vpack.c.bf16 %v276_v35, %v274_v34  ;;  %v275_v39 = vld [vmem:[#allocation2 + $0x1d0] sm:$0xff]  ;;  %v278_v41 = vld [vmem:[#allocation2 + $0x1e8] sm:$0xff]  ;;  %v280_v42 = vld [vmem:[#allocation2 + $0x1f8] sm:$0xff] }
  0x3f   :  { %564 = vmatmul.mubr.msk.f32.gmra.mrb[8].mxu0 %vm78_vm1, %v58_v48  ;;  %v679_v40 = vpack.c.bf16 %v275_v39, %v273_v38  ;;  %v681_v43 = vpack.c.bf16 %v280_v42, %v278_v41  ;;  %v277_v44 = vld [vmem:[#allocation2 + $0x1e0] sm:$0xff]  ;;  %v279_v45 = vld [vmem:[#allocation2 + $0x1f0] sm:$0xff]  ;;  %v423_v48 = vld [vmem:[#allocation4 + $0x88] sm:$0xff]  ;;  %v74_v26 = vsub.s32 1, %v905_v23 }
  0x40   :  { %198 = vmatprep.mubr.f32.mxu0 %v790_v0  ;;  %v653_v0 = vpack.c.bf16 %v252_v63, %v250_v62  ;;  %v683_v46 = vpack.c.bf16 %v279_v45, %v277_v44  ;;  %v422_v47 = vld [vmem:[#allocation4 + $0x80] sm:$0xff]  ;;  %v425_v53 = vld [vmem:[#allocation4 + $0x98] sm:$0xff]  ;;  %v408_v56 = vld [vmem:[#allocation4 + $0x10] sm:$0xff] }
  0x41   :  { %644 = vmatpush1.bf16.msra.mxu1 %v643_v51  ;;  %v406_v49 = vld [vmem:[#allocation4] sm:$0xff]  ;;  %v685_v50 = vpack.c.bf16 %v423_v48, %v422_v47  ;;  %v407_v51 = vld [vmem:[#allocation4 + $0x8] sm:$0xff]  ;;  %v409_v57 = vld [vmem:[#allocation4 + $0x18] sm:$0xff] }
  0x42   :  { %646 = vmatprep.subr.bf16.mxu1 %v645_v52  ;;  %v424_v52 = vld [vmem:[#allocation4 + $0x90] sm:$0xff]  ;;  %v687_v54 = vpack.c.bf16 %v407_v51, %v406_v49  ;;  %v691_v60 = vpack.c.bf16 %v409_v57, %v408_v56  ;;  %v410_v62 = vld [vmem:[#allocation4 + $0x20] sm:$0xff]  ;;  %v411_v63 = vld [vmem:[#allocation4 + $0x28] sm:$0xff] }
  0x43   :  { %565 = vmatmul.mubr.msk.f32.gmra.mrb[10].mxu0 %vm78_vm1, %v59_v55  ;;  %v689_v55 = vpack.c.bf16 %v425_v53, %v424_v52  ;;  %686 = vmatprep.subr.bf16.mxu0 %v685_v50  ;;  %v695_v2 = vpack.c.bf16 %v411_v63, %v410_v62  ;;  %v412_v4 = vld [vmem:[#allocation4 + $0x30] sm:$0xff]  ;;  %v413_v5 = vld [vmem:[#allocation4 + $0x38] sm:$0xff]  ;;  %v414_v10 = vld [vmem:[#allocation4 + $0x40] sm:$0xff] }
  0x44   :  { %688 = vmatpush3.bf16.msra.mxu0 %v687_v54  ;;  %v699_v8 = vpack.c.bf16 %v413_v5, %v412_v4  ;;  %v415_v11 = vld [vmem:[#allocation4 + $0x48] sm:$0xff]  ;;  %v416_v16 = vld [vmem:[#allocation4 + $0x50] sm:$0xff]  ;;  %v417_v17 = vld [vmem:[#allocation4 + $0x58] sm:$0xff] }
  0x45   :  { %648 = vmatpush1.bf16.msra.mxu1 %v647_v58  ;;  %v426_v58 = vld [vmem:[#allocation4 + $0xa0] sm:$0xff]  ;;  %690 = vmatprep.subr.bf16.mxu0 %v689_v55  ;;  %v703_v14 = vpack.c.bf16 %v415_v11, %v414_v10  ;;  %v707_v20 = vpack.c.bf16 %v417_v17, %v416_v16  ;;  %v436_v4 = vld [vmem:[#allocation4 + $0xf0] sm:$0xff]  ;;  %v437_v5 = vld [vmem:[#allocation4 + $0xf8] sm:$0xff] }
  0x46   :  { %650 = vmatprep.subr.bf16.mxu1 %v649_v59  ;;  %v427_v59 = vld [vmem:[#allocation4 + $0xa8] sm:$0xff]  ;;  %v281_v10 = vld [vmem:[%s948_s4] sm:$0x3] }
  0x47   :  { %v693_v61 = vpack.c.bf16 %v427_v59, %v426_v58 }
  0x48   :  { %692 = vmatpush3.bf16.msra.mxu0 %v691_v60 }
  0x49   :  { %652 = vmatpush1.bf16.msra.mxu1 %v651_v1  ;;  %v428_v1 = vld [vmem:[#allocation4 + $0xb0] sm:$0xff]  ;;  %694 = vmatprep.subr.bf16.mxu0 %v693_v61 }
  0x4a   :  { %654 = vmatprep.subr.bf16.mxu1 %v653_v0  ;;  %v429_v0 = vld [vmem:[#allocation4 + $0xb8] sm:$0xff] }
  0x4b   :  { %v697_v3 = vpack.c.bf16 %v429_v0, %v428_v1  ;;  %v418_v0 = vld [vmem:[#allocation4 + $0x60] sm:$0xff] }
  0x4c   :  { %696 = vmatpush3.bf16.msra.mxu0 %v695_v2  ;;  %v419_v2 = vld [vmem:[#allocation4 + $0x68] sm:$0xff] }
  0x4d   :  { %656 = vmatpush1.bf16.msra.mxu1 %v655_v6  ;;  %v430_v6 = vld [vmem:[#allocation4 + $0xc0] sm:$0xff]  ;;  %698 = vmatprep.subr.bf16.mxu0 %v697_v3  ;;  %v711_v3 = vpack.c.bf16 %v419_v2, %v418_v0 }
  0x4e   :  { %658 = vmatprep.subr.bf16.mxu1 %v657_v7  ;;  %v431_v7 = vld [vmem:[#allocation4 + $0xc8] sm:$0xff] }
  0x4f   :  { %v701_v9 = vpack.c.bf16 %v431_v7, %v430_v6  ;;  %v713_v6 = vpack.c.bf16 %v437_v5, %v436_v4  ;;  %v420_v7 = vld [vmem:[#allocation4 + $0x70] sm:$0xff] }
  0x50   :  { %700 = vmatpush3.bf16.msra.mxu0 %v699_v8  ;;  %v421_v8 = vld [vmem:[#allocation4 + $0x78] sm:$0xff] }
  0x51   :  { %660 = vmatpush1.bf16.msra.mxu1 %v659_v12  ;;  %v432_v12 = vld [vmem:[#allocation4 + $0xd0] sm:$0xff]  ;;  %702 = vmatprep.subr.bf16.mxu0 %v701_v9  ;;  %v715_v9 = vpack.c.bf16 %v421_v8, %v420_v7 }
  0x52   :  { %662 = vmatprep.subr.bf16.mxu1 %v661_v13  ;;  %v433_v13 = vld [vmem:[#allocation4 + $0xd8] sm:$0xff] }
  0x53   :  { %v705_v15 = vpack.c.bf16 %v433_v13, %v432_v12  ;;  %v290_v12 = vrot.slane %v281_v10, %v74_v26 }
  0x54   :  { %704 = vmatpush3.bf16.msra.mxu0 %v703_v14 }
  0x55   :  { %664 = vmatpush1.bf16.msra.mxu1 %v663_v18  ;;  %v434_v18 = vld [vmem:[#allocation4 + $0xe0] sm:$0xff]  ;;  %706 = vmatprep.subr.bf16.mxu0 %v705_v15 }
  0x56   :  { %666 = vmatprep.subr.bf16.mxu1 %v665_v19  ;;  %v435_v19 = vld [vmem:[#allocation4 + $0xe8] sm:$0xff] }
  0x57   :  { %v709_v21 = vpack.c.bf16 %v435_v19, %v434_v18 }
  0x58   :  { %708 = vmatpush3.bf16.msra.mxu0 %v707_v20 }
  0x59   :  { %668 = vmatpush1.bf16.msra.mxu1 %v667_v24  ;;  %710 = vmatprep.subr.bf16.mxu0 %v709_v21  ;;  %v70_v24 = vsub.s32 0, %v905_v23 }
  0x5a   :  { %670 = vmatprep.subr.bf16.mxu1 %v669_v25  ;;  %v66_v25 = vld [vmem:[%s946_s2] sm:$0x3] }
  0x5b   :  { %v71_v27 = vrot.slane %v66_v25, %v70_v24  ;;  %v75_v28 = vrot.slane %v66_v25, %v74_v26  ;;  %v286_v11 = vrot.slane %v281_v10, %v70_v24 }
  0x5c   :  { %712 = vmatpush3.bf16.msra.mxu0 %v711_v3 }
  0x5d   :  { %672 = vmatpush1.bf16.msra.mxu1 %v671_v30  ;;  %714 = vmatprep.subr.bf16.mxu0 %v713_v6 }
  0x5e   :  { %674 = vmatprep.subr.bf16.mxu1 %v673_v31 }
  0x60   :  { %716 = vmatpush3.bf16.msra.mxu0 %v715_v9 }
  0x61   :  { %676 = vmatpush1.bf16.msra.mxu1 %v675_v36 }
  0x62   :  { %678 = vmatprep.subr.bf16.mxu1 %v677_v37 }
  0x65   :  { %680 = vmatpush1.bf16.msra.mxu1 %v679_v40 }
  0x66   :  { %682 = vmatprep.subr.bf16.mxu1 %v681_v43 }
  0x69   :  { %684 = vmatpush1.bf16.msra.mxu1 %v683_v46 }
 0x102   :  { %v170_v29 = vpop.f32.mrb[0].mxu0 }
 0x103   :  { %v171_v30 = vadd.f32 %v170_v29, %v71_v27  ;;  %v172_v31 = vpop.f32.mrb[1].mxu0 }
 0x104   :  { %v173_v32 = vadd.f32 %v172_v31, %v75_v28 }
 0x105   :  { %v205_v35 = vmax.f32 %v171_v30, 0.0 }
 0x106   :  { %v176_v33 = vpop.f32.mrb[2].mxu0  ;;  %v206_v34 = vmax.f32 %v173_v32, 0.0 }
 0x107   :  { %v177_v36 = vadd.f32 %v176_v33, %v71_v27  ;;  %v178_v37 = vpop.f32.mrb[3].mxu0 }
 0x108   :  { %v179_v38 = vadd.f32 %v178_v37, %v75_v28  ;;  %357 = vmatprep.mubr.f32.mxu1 %v206_v34 }
 0x109   :  { %358 = vmatmul.mubr.f32.vlgmr.msra.gmra.mrb[0].mxu1 %v205_v35  ;;  %v207_v41 = vmax.f32 %v177_v36, 0.0 }
 0x10a   :  { %v208_v39 = vmax.f32 %v179_v38, 0.0  ;;  %v182_v40 = vpop.f32.mrb[4].mxu0 }
 0x10b   :  { %v183_v42 = vadd.f32 %v182_v40, %v71_v27  ;;  %v184_v43 = vpop.f32.mrb[5].mxu0 }
 0x10c   :  { %v185_v44 = vadd.f32 %v184_v43, %v75_v28  ;;  %363 = vmatprep.mubr.f32.mxu1 %v208_v39 }
 0x10d   :  { %364 = vmatmul.mubr.f32.gmra.mrb[2].mxu1 %v207_v41  ;;  %v209_v47 = vmax.f32 %v183_v42, 0.0 }
 0x10e   :  { %v210_v45 = vmax.f32 %v185_v44, 0.0  ;;  %v188_v46 = vpop.f32.mrb[6].mxu0 }
 0x10f   :  { %v189_v48 = vadd.f32 %v188_v46, %v71_v27  ;;  %v190_v49 = vpop.f32.mrb[7].mxu0 }
 0x110   :  { %v191_v50 = vadd.f32 %v190_v49, %v75_v28  ;;  %369 = vmatprep.mubr.f32.mxu1 %v210_v45 }
 0x111   :  { %370 = vmatmul.mubr.f32.gmra.mrb[4].mxu1 %v209_v47  ;;  %v211_v53 = vmax.f32 %v189_v48, 0.0 }
 0x112   :  { %v212_v51 = vmax.f32 %v191_v50, 0.0  ;;  %v194_v52 = vpop.f32.mrb[8].mxu0  ;;  %v566_v50 = vld [vmem:[%s950_s6] ss:$0 sm:$0xff] }
 0x113   :  { %v195_v54 = vadd.f32 %v194_v52, %v71_v27  ;;  %v196_v55 = vpop.f32.mrb[9].mxu0 }
 0x114   :  { %v197_v56 = vadd.f32 %v196_v55, %v75_v28  ;;  %375 = vmatprep.mubr.f32.mxu1 %v212_v51 }
 0x115   :  { %376 = vmatmul.mubr.f32.gmra.mrb[6].mxu1 %v211_v53  ;;  %v213_v59 = vmax.f32 %v195_v54, 0.0 }
 0x116   :  { %v214_v57 = vmax.f32 %v197_v56, 0.0  ;;  %v200_v58 = vpop.f32.mrb[10].mxu0 }
 0x117   :  { %v201_v60 = vadd.f32 %v200_v58, %v71_v27  ;;  %v202_v61 = vpop.f32.mrb[11].mxu0 }
 0x118   :  { %v203_v62 = vadd.f32 %v202_v61, %v75_v28  ;;  %381 = vmatprep.mubr.f32.mxu1 %v214_v57 }
 0x119   :  { %382 = vmatmul.mubr.f32.gmra.mrb[8].mxu1 %v213_v59  ;;  %v215_v1 = vmax.f32 %v201_v60, 0.0 }
 0x11a   :  { %v216_v63 = vmax.f32 %v203_v62, 0.0 }
 0x11c   :  { %387 = vmatprep.mubr.f32.mxu1 %v216_v63 }
 0x11d   :  { %388 = vmatmul.mubr.f32.gmra.mrb[10].mxu1 %v215_v1 }
 0x1dc   :  { %v359_v13 = vpop.f32.mrb[0].mxu1 }
 0x1dd   :  { %v360_v14 = vadd.f32 %v359_v13, %v286_v11  ;;  %v361_v15 = vpop.f32.mrb[1].mxu1 }
 0x1de   :  { %v362_v16 = vadd.f32 %v361_v15, %v290_v12 }
 0x1df   :  { %v394_v19 = vmax.f32 %v360_v14, 0.0 }
 0x1e0   :  { %v395_v17 = vmax.f32 %v362_v16, 0.0  ;;  %v365_v18 = vpop.f32.mrb[2].mxu1 }
 0x1e1   :  { %v366_v20 = vadd.f32 %v365_v18, %v286_v11  ;;  %v367_v21 = vpop.f32.mrb[3].mxu1 }
 0x1e2   :  { %v368_v22 = vadd.f32 %v367_v21, %v290_v12  ;;  %509 = vmatprep.mubr.f32.mxu0 %v395_v17 }
 0x1e3   :  { %510 = vmatmul.mubr.f32.vlgmr.msra.gmra.mrb[12].mxu0 %v394_v19  ;;  %v396_v28 = vmax.f32 %v366_v20, 0.0 }
 0x1e4   :  { %v397_v25 = vmax.f32 %v368_v22, 0.0  ;;  %v371_v27 = vpop.f32.mrb[4].mxu1 }
 0x1e5   :  { %v372_v29 = vadd.f32 %v371_v27, %v286_v11  ;;  %v373_v24 = vpop.f32.mrb[5].mxu1 }
 0x1e6   :  { %v374_v30 = vadd.f32 %v373_v24, %v290_v12  ;;  %514 = vmatprep.mubr.f32.mxu0 %v397_v25 }
 0x1e7   :  { %515 = vmatmul.mubr.f32.gmra.mrb[14].mxu0 %v396_v28  ;;  %v398_v31 = vmax.f32 %v372_v29, 0.0 }
 0x1e8   :  { %v399_v23 = vmax.f32 %v374_v30, 0.0  ;;  %v377_v26 = vpop.f32.mrb[6].mxu1 }
 0x1e9   :  { %v378_v32 = vadd.f32 %v377_v26, %v286_v11  ;;  %v379_v33 = vpop.f32.mrb[7].mxu1 }
 0x1ea   :  { %v380_v34 = vadd.f32 %v379_v33, %v290_v12  ;;  %519 = vmatprep.mubr.f32.mxu0 %v399_v23 }
 0x1eb   :  { %520 = vmatmul.mubr.f32.gmra.mrb[16].mxu0 %v398_v31  ;;  %v400_v37 = vmax.f32 %v378_v32, 0.0 }
 0x1ec   :  { %v401_v35 = vmax.f32 %v380_v34, 0.0  ;;  %v383_v36 = vpop.f32.mrb[8].mxu1 }
 0x1ed   :  { %v384_v38 = vadd.f32 %v383_v36, %v286_v11  ;;  %v385_v39 = vpop.f32.mrb[9].mxu1 }
 0x1ee   :  { %v386_v40 = vadd.f32 %v385_v39, %v290_v12  ;;  %524 = vmatprep.mubr.f32.mxu0 %v401_v35 }
 0x1ef   :  { %525 = vmatmul.mubr.f32.gmra.mrb[18].mxu0 %v400_v37  ;;  %v402_v43 = vmax.f32 %v384_v38, 0.0 }
 0x1f0   :  { %v403_v41 = vmax.f32 %v386_v40, 0.0  ;;  %v389_v42 = vpop.f32.mrb[10].mxu1 }
 0x1f1   :  { %v390_v44 = vadd.f32 %v389_v42, %v286_v11  ;;  %v391_v45 = vpop.f32.mrb[11].mxu1 }
 0x1f2   :  { %v392_v46 = vadd.f32 %v391_v45, %v290_v12  ;;  %529 = vmatprep.mubr.f32.mxu0 %v403_v41 }
 0x1f3   :  { %530 = vmatmul.mubr.f32.gmra.mrb[20].mxu0 %v402_v43  ;;  %v404_v48 = vmax.f32 %v390_v44, 0.0 }
 0x1f4   :  { %v405_v47 = vmax.f32 %v392_v46, 0.0 }
 0x1f6   :  { %534 = vmatprep.mubr.f32.mxu0 %v405_v47 }
 0x1f7   :  { %535 = vmatmul.mubr.f32.gmra.mrb[22].mxu0 %v404_v48 }
 0x2b6   :  { %v599_v49 = vpop.f32.mrb[12].mxu0 }
 0x2b7   :  { %v600_v51 = vpop.f32.mrb[13].mxu0 }
 0x2b8   :  { %v601_v52 = vadd.f32 %v600_v51, %v599_v49 }
 0x2ba   :  { %v512_v53 = vadd.f32 %v601_v52, %v566_v50  ;;  %v602_v54 = vpop.f32.mrb[14].mxu0 }
 0x2bb   :  { %v603_v55 = vpop.f32.mrb[15].mxu0 }
 0x2bc   :  { %724 = vtanh.f32 %v512_v53  ;;  %v604_v56 = vadd.f32 %v603_v55, %v602_v54 }
 0x2be   :  { %v517_v57 = vadd.f32 %v604_v56, %v566_v50  ;;  %v605_v58 = vpop.f32.mrb[16].mxu0 }
 0x2bf   :  { %v606_v59 = vpop.f32.mrb[17].mxu0 }
 0x2c0   :  { %726 = vtanh.f32 %v517_v57  ;;  %v607_v60 = vadd.f32 %v606_v59, %v605_v58 }
 0x2c2   :  { %v522_v61 = vadd.f32 %v607_v60, %v566_v50  ;;  %v608_v62 = vpop.f32.mrb[18].mxu0 }
 0x2c3   :  { %v609_v63 = vpop.f32.mrb[19].mxu0 }
 0x2c4   :  { %728 = vtanh.f32 %v522_v61  ;;  %v610_v1 = vadd.f32 %v609_v63, %v608_v62 }
 0x2c6   :  { %v725_v0 = vpop.eup %724  ;;  %v527_v2 = vadd.f32 %v610_v1, %v566_v50  ;;  %v611_v3 = vpop.f32.mrb[20].mxu0 }
 0x2c7   :  { %546 = vst [vmem:[%s951_s7] sm:$0xff] %v725_v0  ;;  %v612_v4 = vpop.f32.mrb[21].mxu0 }
 0x2c8   :  { %730 = vtanh.f32 %v527_v2  ;;  %v613_v5 = vadd.f32 %v612_v4, %v611_v3 }
 0x2ca   :  { %v727_v6 = vpop.eup %726  ;;  %v532_v7 = vadd.f32 %v613_v5, %v566_v50  ;;  %v614_v8 = vpop.f32.mrb[22].mxu0 }
 0x2cb   :  { %547 = vst [vmem:[%s951_s7 + $0x8] sm:$0xff] %v727_v6  ;;  %v615_v9 = vpop.f32.mrb[23].mxu0 }
 0x2cc   :  { %732 = vtanh.f32 %v532_v7  ;;  %v616_v10 = vadd.f32 %v615_v9, %v614_v8 }
 0x2ce   :  { %v729_v11 = vpop.eup %728  ;;  %v537_v12 = vadd.f32 %v616_v10, %v566_v50 }
 0x2cf   :  { %548 = vst [vmem:[%s951_s7 + $0x10] sm:$0xff] %v729_v11 }
 0x2d0   :  { %734 = vtanh.f32 %v537_v12 }
 0x2d2   :  { %v731_v13 = vpop.eup %730 }
 0x2d3   :  { %549 = vst [vmem:[%s951_s7 + $0x18] sm:$0xff] %v731_v13 }
 0x2d6   :  { %v733_v14 = vpop.eup %732 }
 0x2d7   :  { %550 = vst [vmem:[%s951_s7 + $0x20] sm:$0xff] %v733_v14 }
 0x2da   :  { %v735_v15 = vpop.eup %734 }
 0x2db   :  { %551 = vst [vmem:[%s951_s7 + $0x28] sm:$0xff] %v735_v15 }
 0x2dc   :  { %556 = vsyncpa [#allocation3], 1 }
 0x2dd   :  { %557 = vsyncpa [#allocation5], 1 }

</bundles_post_ra>
